<compile_context>
chip_gen: v7x
topology: tpu7x:2x2x1
jax: 0.10.0
libtpu: 0.0.40
codegen_flags: <defaults>
</compile_context>

<pallas_src>
from typing import Dict

import jax
import jax.numpy as jnp
from jax.experimental import pallas as pl
from jax.experimental.pallas import tpu as pltpu


# --------------------------------------------------------------------------
# Fused Pallas kernel (log_softmax for every key + MLP for every masked key)
# --------------------------------------------------------------------------
def _make_fused_kernel(n_keys, beta_idx, masked_idx, normalize_probs):
    n_beta = len(beta_idx)
    n_masked = len(masked_idx)

    def kernel(*refs):
        leak_refs = refs[:n_keys]
        w1_ref, b1_ref, w2_ref, b2_ref = refs[n_keys:n_keys + 4]
        ls_refs = refs[n_keys + 4:2 * n_keys + 4]
        tgt_refs = refs[2 * n_keys + 4:]

        b1 = b1_ref[...].astype(jnp.float32)            # (1, H)
        b2 = b2_ref[...].astype(jnp.float32)            # (1, K)
        dt = w1_ref.dtype                                # matmul input dtype

        # (1) row-wise log_softmax for every leakage key; keep MLP inputs.
        mlp_in = [None] * n_keys
        for i in range(n_keys):                          # static unroll (few keys)
            x = leak_refs[i][...].astype(jnp.float32)    # (TB, K)
            m = jnp.max(x, axis=-1, keepdims=True)
            z = x - m
            lse = jnp.log(jnp.sum(jnp.exp(z), axis=-1, keepdims=True))
            ls = z - lse
            ls_refs[i][...] = ls.astype(ls_refs[i].dtype)
            mlp_in[i] = (jnp.exp(ls) if normalize_probs else x).astype(dt)

        if n_masked == 0:
            return

        # (2) beta-share hidden contribution: computed once, reused per target.
        #     cat([beta..., masked]) @ W1 == sum_s leak_s @ W1[s]  (W1 pre-split)
        beta_h = jnp.zeros((leak_refs[0].shape[0], b1.shape[-1]), jnp.float32)
        for s, b in enumerate(beta_idx):                 # static unroll
            beta_h = beta_h + jnp.dot(mlp_in[b], w1_ref[s],
                                      preferred_element_type=jnp.float32)

        w1_masked = w1_ref[n_beta]                       # last W1 input block
        w2 = w2_ref[...]
        for j, m_idx in enumerate(masked_idx):           # static unroll
            h = beta_h + jnp.dot(mlp_in[m_idx], w1_masked,
                                 preferred_element_type=jnp.float32) + b1
            h = jnp.maximum(h, 0.0)
            y = jnp.dot(h.astype(dt), w2,
                        preferred_element_type=jnp.float32) + b2
            my = jnp.max(y, axis=-1, keepdims=True)
            zy = y - my
            lse = jnp.log(jnp.sum(jnp.exp(zy), axis=-1, keepdims=True))
            tgt_refs[j][...] = (zy - lse).astype(tgt_refs[j].dtype)

    return kernel


# --------------------------------------------------------------------------
# NaiveRecombine forward (matches the PyTorch module semantics)
# --------------------------------------------------------------------------
def naive_recombine_forward(
    leakages: Dict[str, jax.Array],
    params: Dict[str, jax.Array],
    n_shares: int,
    n_bits: int,
    *,
    normalize_probs: bool = False,      # NaiveRecombine default
    matmul_dtype=jnp.float32,           # jnp.bfloat16 recommended on v6e/v7x
    block_rows: int = 512,
) -> Dict[str, jax.Array]:
    K = 1 << n_bits
    keys = list(leakages.keys())
    n_keys = len(keys)
    beta_keys = [k for k in keys if "beta" in k]
    masked_keys = [k for k in keys if "masked" in k]
    beta_idx = [keys.index(k) for k in beta_keys]
    masked_idx = [keys.index(k) for k in masked_keys]
    n_masked = len(masked_keys)

    B = leakages[keys[0]].shape[0]
    H = params["b1"].shape[-1]

    # Batch tiling: biggest tile that fits block_rows, sublane-aligned.
    if B <= block_rows:
        tb, Bp, pad = B, B, 0
    else:
        tb = max(8, block_rows - block_rows % 8)
        pad = (-B) % tb
        Bp = B + pad

    leaks = [leakages[k] for k in keys]
    if pad:
        leaks = [jnp.pad(x, ((0, pad), (0, 0))) for x in leaks]

    # W1 stored as (n_shares*K, H) in (input, output) layout -> split per share.
    w1 = params["w1"].reshape(n_shares, K, H).astype(matmul_dtype)
    w2 = params["w2"].astype(matmul_dtype)
    b1 = params["b1"].reshape(1, H)
    b2 = params["b2"].reshape(1, K)

    row_spec = pl.BlockSpec((tb, K), lambda i: (i, 0))
    in_specs = (
        [row_spec] * n_keys
        + [
            pl.BlockSpec((n_shares, K, H), lambda i: (0, 0, 0)),  # W1 (resident)
            pl.BlockSpec((1, H), lambda i: (0, 0)),               # b1
            pl.BlockSpec((H, K), lambda i: (0, 0)),               # W2
            pl.BlockSpec((1, K), lambda i: (0, 0)),               # b2
        ]
    )
    out_specs = tuple([row_spec] * (n_keys + n_masked))
    out_shape = tuple(
        jax.ShapeDtypeStruct((Bp, K), jnp.float32)
        for _ in range(n_keys + n_masked)
    )

    outs = pl.pallas_call(
        _make_fused_kernel(n_keys, beta_idx, masked_idx, normalize_probs),
        out_shape=out_shape,
        grid=(Bp // tb,),
        in_specs=in_specs,
        out_specs=out_specs,
        compiler_params=pltpu.CompilerParams(
            dimension_semantics=("parallel",)),
    )(*leaks, w1, b1, w2, b2)

    log_probas = {k: outs[i][:B] for i, k in enumerate(keys)}
    for j, mk in enumerate(masked_keys):
        log_probas["target_" + mk.split("_")[1]] = outs[n_keys + j][:B]
    return log_probas


# --------------------------------------------------------------------------
# Main
# --------------------------------------------------------------------------
if __name__ == "__main__":
    # Small, module-consistent shapes.
    n_bits = 4                 # 1 << n_bits = 16 classes
    n_shares = 3               # 2 beta shares + 1 masked share
    n_hidden = 32
    batch = 16
    K = 1 << n_bits

    key = jax.random.PRNGKey(0)
    k_b0, k_b1, k_mx, k_my, k_w1, k_bb1, k_w2, k_bb2 = jax.random.split(key, 8)

    leakages = {
        "beta_0":   jax.random.normal(k_b0, (batch, K), dtype=jnp.float32),
        "beta_1":   jax.random.normal(k_b1, (batch, K), dtype=jnp.float32),
        "masked_x": jax.random.normal(k_mx, (batch, K), dtype=jnp.float32),
        "masked_y": jax.random.normal(k_my, (batch, K), dtype=jnp.float32),
    }

    # Parameter init mimicking torch.nn.Linear (U[-1/sqrt(fan_in), +]).
    fan_in1 = n_shares * K
    fan_in2 = n_hidden
    lim1 = 1.0 / (fan_in1 ** 0.5)
    lim2 = 1.0 / (fan_in2 ** 0.5)
    params = {
        # stored already transposed to (in, out) so kernels compute x @ W
        "w1": jax.random.uniform(k_w1, (fan_in1, n_hidden), jnp.float32, -lim1, lim1),
        "b1": jax.random.uniform(k_bb1, (1, n_hidden), jnp.float32, -lim1, lim1),
        "w2": jax.random.uniform(k_w2, (n_hidden, K), jnp.float32, -lim2, lim2),
        "b2": jax.random.uniform(k_bb2, (1, K), jnp.float32, -lim2, lim2),
    }

    # block_rows=8 so the batch-tiled grid takes multiple steps at this tiny
    # size (production default is 512 rows per tile).
    out = naive_recombine_forward(leakages, params, n_shares, n_bits,
                                  block_rows=8)
    out = jax.tree_util.tree_map(jax.block_until_ready, out)

    # ---- pure-JAX reference mirroring the PyTorch module ----
    ref = {k: jax.nn.log_softmax(v, axis=-1) for k, v in leakages.items()}
    p_beta = jnp.stack([v for k, v in leakages.items() if "beta" in k], axis=1)
    for mk, tv in {k: v for k, v in leakages.items() if "masked" in k}.items():
        cat = jnp.concatenate((p_beta, tv[:, None, :]), axis=1)
        cat = cat.reshape(-1, n_shares * K)
        h = jnp.maximum(cat @ params["w1"] + params["b1"], 0.0)
        ref["target_" + mk.split("_")[1]] = jax.nn.log_softmax(
            h @ params["w2"] + params["b2"], axis=-1)

    assert set(out.keys()) == set(ref.keys()), (sorted(out), sorted(ref))
    for k in ref:
        assert jnp.allclose(out[k], ref[k], atol=1e-5, rtol=1e-5), k

    # Also exercise the no-padding / single-tile path and normalize_probs=True.
    out_norm = naive_recombine_forward(leakages, params, n_shares, n_bits,
                                       normalize_probs=True)
    out_norm = jax.tree_util.tree_map(jax.block_until_ready, out_norm)
    p_beta_n = jax.nn.softmax(p_beta, axis=-1)
    for mk, tv in {k: v for k, v in leakages.items() if "masked" in k}.items():
        cat = jnp.concatenate((p_beta_n, jax.nn.softmax(tv)[:, None, :]), axis=1)
        cat = cat.reshape(-1, n_shares * K)
        h = jnp.maximum(cat @ params["w1"] + params["b1"], 0.0)
        r = jax.nn.log_softmax(h @ params["w2"] + params["b2"], axis=-1)
        assert jnp.allclose(out_norm["target_" + mk.split("_")[1]], r,
                            atol=1e-5, rtol=1e-5), mk

    # bf16-fed MXU path (v6e/v7x optimization): f32 accumulation + f32 softmax,
    # so only a slightly looser tolerance is needed.
    out_bf16 = naive_recombine_forward(leakages, params, n_shares, n_bits,
                                       block_rows=8,
                                       matmul_dtype=jnp.bfloat16)
    out_bf16 = jax.tree_util.tree_map(jax.block_until_ready, out_bf16)
    for k in ("target_x", "target_y"):
        assert jnp.allclose(out_bf16[k], ref[k], atol=3e-2, rtol=3e-2), k

    print("KERNEL_OK")
</pallas_src>

<mosaic_0001>
module attributes {stable_mosaic.version = 11 : i64} {
  func.func @kernel(%arg0: i32, %arg1: memref<8x16xf32, #tpu.memory_space<vmem>>, %arg2: memref<8x16xf32, #tpu.memory_space<vmem>>, %arg3: memref<8x16xf32, #tpu.memory_space<vmem>>, %arg4: memref<8x16xf32, #tpu.memory_space<vmem>>, %arg5: memref<3x16x32xf32, #tpu.memory_space<vmem>>, %arg6: memref<1x32xf32, #tpu.memory_space<vmem>>, %arg7: memref<32x16xf32, #tpu.memory_space<vmem>>, %arg8: memref<1x16xf32, #tpu.memory_space<vmem>>, %arg9: memref<8x16xf32, #tpu.memory_space<vmem>>, %arg10: memref<8x16xf32, #tpu.memory_space<vmem>>, %arg11: memref<8x16xf32, #tpu.memory_space<vmem>>, %arg12: memref<8x16xf32, #tpu.memory_space<vmem>>, %arg13: memref<8x16xf32, #tpu.memory_space<vmem>>, %arg14: memref<8x16xf32, #tpu.memory_space<vmem>>) attributes {dimension_semantics = [#tpu.dimension_semantics<parallel>], iteration_bounds = array<i64: 2>, scalar_prefetch = 0 : i64, scratch_operands = 0 : i64, tpu.core_type = #tpu.core_type<tc>, window_params = [{transform_indices = @transform_0, window_bounds = array<i64: 8, 16>}, {transform_indices = @transform_1, window_bounds = array<i64: 8, 16>}, {transform_indices = @transform_2, window_bounds = array<i64: 8, 16>}, {transform_indices = @transform_3, window_bounds = array<i64: 8, 16>}, {pipeline_mode = #tpu.pipeline_mode<synchronous>, transform_indices = @transform_4, window_bounds = array<i64: 3, 16, 32>}, {pipeline_mode = #tpu.pipeline_mode<synchronous>, transform_indices = @transform_5, window_bounds = array<i64: 1, 32>}, {pipeline_mode = #tpu.pipeline_mode<synchronous>, transform_indices = @transform_6, window_bounds = array<i64: 32, 16>}, {pipeline_mode = #tpu.pipeline_mode<synchronous>, transform_indices = @transform_7, window_bounds = array<i64: 1, 16>}, {transform_indices = @transform_8, window_bounds = array<i64: 8, 16>}, {transform_indices = @transform_9, window_bounds = array<i64: 8, 16>}, {transform_indices = @transform_10, window_bounds = array<i64: 8, 16>}, {transform_indices = @transform_11, window_bounds = array<i64: 8, 16>}, {transform_indices = @transform_12, window_bounds = array<i64: 8, 16>}, {transform_indices = @transform_13, window_bounds = array<i64: 8, 16>}]} {
    %c0 = arith.constant 0 : index
    %c0_0 = arith.constant 0 : index
    %0 = vector.load %arg6[%c0, %c0_0] : memref<1x32xf32, #tpu.memory_space<vmem>>, vector<1x32xf32>
    %c0_1 = arith.constant 0 : index
    %c0_2 = arith.constant 0 : index
    %1 = vector.load %arg8[%c0_1, %c0_2] : memref<1x16xf32, #tpu.memory_space<vmem>>, vector<1x16xf32>
    %c0_3 = arith.constant 0 : index
    %c0_4 = arith.constant 0 : index
    %2 = vector.load %arg1[%c0_3, %c0_4] : memref<8x16xf32, #tpu.memory_space<vmem>>, vector<8x16xf32>
    %cst = arith.constant dense<0xFF800000> : vector<8xf32>
    %3 = vector.multi_reduction <maximumf>, %2, %cst [1] : vector<8x16xf32> to vector<8xf32>
    %4 = vector.shape_cast %3 : vector<8xf32> to vector<8x1xf32>
    %5 = vector.broadcast %4 : vector<8x1xf32> to vector<8x16xf32>
    %6 = arith.subf %2, %5 : vector<8x16xf32>
    %7 = math.exp %6 : vector<8x16xf32>
    %cst_5 = arith.constant dense<0.000000e+00> : vector<8xf32>
    %8 = vector.multi_reduction <add>, %7, %cst_5 [1] : vector<8x16xf32> to vector<8xf32>
    %9 = vector.shape_cast %8 : vector<8xf32> to vector<8x1xf32>
    %10 = math.log %9 : vector<8x1xf32>
    %11 = vector.broadcast %10 : vector<8x1xf32> to vector<8x16xf32>
    %12 = arith.subf %6, %11 : vector<8x16xf32>
    %c0_6 = arith.constant 0 : index
    %c0_7 = arith.constant 0 : index
    %13 = vector.load %arg9[%c0_6, %c0_7] : memref<8x16xf32, #tpu.memory_space<vmem>>, vector<8x16xf32>
    tpu.vector_store %arg9[%c0_6, %c0_7], %12 {strides = array<i32>} : memref<8x16xf32, #tpu.memory_space<vmem>>, vector<8x16xf32>,
    %c0_8 = arith.constant 0 : index
    %c0_9 = arith.constant 0 : index
    %14 = vector.load %arg2[%c0_8, %c0_9] : memref<8x16xf32, #tpu.memory_space<vmem>>, vector<8x16xf32>
    %cst_10 = arith.constant dense<0xFF800000> : vector<8xf32>
    %15 = vector.multi_reduction <maximumf>, %14, %cst_10 [1] : vector<8x16xf32> to vector<8xf32>
    %16 = vector.shape_cast %15 : vector<8xf32> to vector<8x1xf32>
    %17 = vector.broadcast %16 : vector<8x1xf32> to vector<8x16xf32>
    %18 = arith.subf %14, %17 : vector<8x16xf32>
    %19 = math.exp %18 : vector<8x16xf32>
    %cst_11 = arith.constant dense<0.000000e+00> : vector<8xf32>
    %20 = vector.multi_reduction <add>, %19, %cst_11 [1] : vector<8x16xf32> to vector<8xf32>
    %21 = vector.shape_cast %20 : vector<8xf32> to vector<8x1xf32>
    %22 = math.log %21 : vector<8x1xf32>
    %23 = vector.broadcast %22 : vector<8x1xf32> to vector<8x16xf32>
    %24 = arith.subf %18, %23 : vector<8x16xf32>
    %c0_12 = arith.constant 0 : index
    %c0_13 = arith.constant 0 : index
    %25 = vector.load %arg10[%c0_12, %c0_13] : memref<8x16xf32, #tpu.memory_space<vmem>>, vector<8x16xf32>
    tpu.vector_store %arg10[%c0_12, %c0_13], %24 {strides = array<i32>} : memref<8x16xf32, #tpu.memory_space<vmem>>, vector<8x16xf32>,
    %c0_14 = arith.constant 0 : index
    %c0_15 = arith.constant 0 : index
    %26 = vector.load %arg3[%c0_14, %c0_15] : memref<8x16xf32, #tpu.memory_space<vmem>>, vector<8x16xf32>
    %cst_16 = arith.constant dense<0xFF800000> : vector<8xf32>
    %27 = vector.multi_reduction <maximumf>, %26, %cst_16 [1] : vector<8x16xf32> to vector<8xf32>
    %28 = vector.shape_cast %27 : vector<8xf32> to vector<8x1xf32>
    %29 = vector.broadcast %28 : vector<8x1xf32> to vector<8x16xf32>
    %30 = arith.subf %26, %29 : vector<8x16xf32>
    %31 = math.exp %30 : vector<8x16xf32>
    %cst_17 = arith.constant dense<0.000000e+00> : vector<8xf32>
    %32 = vector.multi_reduction <add>, %31, %cst_17 [1] : vector<8x16xf32> to vector<8xf32>
    %33 = vector.shape_cast %32 : vector<8xf32> to vector<8x1xf32>
    %34 = math.log %33 : vector<8x1xf32>
    %35 = vector.broadcast %34 : vector<8x1xf32> to vector<8x16xf32>
    %36 = arith.subf %30, %35 : vector<8x16xf32>
    %c0_18 = arith.constant 0 : index
    %c0_19 = arith.constant 0 : index
    %37 = vector.load %arg11[%c0_18, %c0_19] : memref<8x16xf32, #tpu.memory_space<vmem>>, vector<8x16xf32>
    tpu.vector_store %arg11[%c0_18, %c0_19], %36 {strides = array<i32>} : memref<8x16xf32, #tpu.memory_space<vmem>>, vector<8x16xf32>,
    %c0_20 = arith.constant 0 : index
    %c0_21 = arith.constant 0 : index
    %38 = vector.load %arg4[%c0_20, %c0_21] : memref<8x16xf32, #tpu.memory_space<vmem>>, vector<8x16xf32>
    %cst_22 = arith.constant dense<0xFF800000> : vector<8xf32>
    %39 = vector.multi_reduction <maximumf>, %38, %cst_22 [1] : vector<8x16xf32> to vector<8xf32>
    %40 = vector.shape_cast %39 : vector<8xf32> to vector<8x1xf32>
    %41 = vector.broadcast %40 : vector<8x1xf32> to vector<8x16xf32>
    %42 = arith.subf %38, %41 : vector<8x16xf32>
    %43 = math.exp %42 : vector<8x16xf32>
    %cst_23 = arith.constant dense<0.000000e+00> : vector<8xf32>
    %44 = vector.multi_reduction <add>, %43, %cst_23 [1] : vector<8x16xf32> to vector<8xf32>
    %45 = vector.shape_cast %44 : vector<8xf32> to vector<8x1xf32>
    %46 = math.log %45 : vector<8x1xf32>
    %47 = vector.broadcast %46 : vector<8x1xf32> to vector<8x16xf32>
    %48 = arith.subf %42, %47 : vector<8x16xf32>
    %c0_24 = arith.constant 0 : index
    %c0_25 = arith.constant 0 : index
    %49 = vector.load %arg12[%c0_24, %c0_25] : memref<8x16xf32, #tpu.memory_space<vmem>>, vector<8x16xf32>
    tpu.vector_store %arg12[%c0_24, %c0_25], %48 {strides = array<i32>} : memref<8x16xf32, #tpu.memory_space<vmem>>, vector<8x16xf32>,
    %cst_26 = arith.constant 0.000000e+00 : f32
    %50 = vector.broadcast %cst_26 : f32 to vector<8x32xf32>
    %c0_27 = arith.constant 0 : index
    %c0_28 = arith.constant 0 : index
    %c0_29 = arith.constant 0 : index
    %51 = vector.load %arg5[%c0_27, %c0_28, %c0_29] : memref<3x16x32xf32, #tpu.memory_space<vmem>>, vector<1x16x32xf32>
    %52 = vector.shape_cast %51 : vector<1x16x32xf32> to vector<16x32xf32>
    %cst_30 = arith.constant dense<0.000000e+00> : vector<8x32xf32>
    %53 = tpu.matmul %2, %52, %cst_30 {dimension_numbers = #tpu.dot_dimension_numbers<[1], [0], [0], [1], [0, 0, 1, 1], [], []>} : vector<8x16xf32>, vector<16x32xf32>, vector<8x32xf32> -> vector<8x32xf32>
    %54 = arith.addf %50, %53 : vector<8x32xf32>
    %c1 = arith.constant 1 : index
    %c0_31 = arith.constant 0 : index
    %c0_32 = arith.constant 0 : index
    %55 = vector.load %arg5[%c1, %c0_31, %c0_32] : memref<3x16x32xf32, #tpu.memory_space<vmem>>, vector<1x16x32xf32>
    %56 = vector.shape_cast %55 : vector<1x16x32xf32> to vector<16x32xf32>
    %cst_33 = arith.constant dense<0.000000e+00> : vector<8x32xf32>
    %57 = tpu.matmul %14, %56, %cst_33 {dimension_numbers = #tpu.dot_dimension_numbers<[1], [0], [0], [1], [0, 0, 1, 1], [], []>} : vector<8x16xf32>, vector<16x32xf32>, vector<8x32xf32> -> vector<8x32xf32>
    %58 = arith.addf %54, %57 : vector<8x32xf32>
    %c2 = arith.constant 2 : index
    %c0_34 = arith.constant 0 : index
    %c0_35 = arith.constant 0 : index
    %59 = vector.load %arg5[%c2, %c0_34, %c0_35] : memref<3x16x32xf32, #tpu.memory_space<vmem>>, vector<1x16x32xf32>
    %60 = vector.shape_cast %59 : vector<1x16x32xf32> to vector<16x32xf32>
    %c0_36 = arith.constant 0 : index
    %c0_37 = arith.constant 0 : index
    %61 = vector.load %arg7[%c0_36, %c0_37] : memref<32x16xf32, #tpu.memory_space<vmem>>, vector<32x16xf32>
    %cst_38 = arith.constant dense<0.000000e+00> : vector<8x32xf32>
    %62 = tpu.matmul %26, %60, %cst_38 {dimension_numbers = #tpu.dot_dimension_numbers<[1], [0], [0], [1], [0, 0, 1, 1], [], []>} : vector<8x16xf32>, vector<16x32xf32>, vector<8x32xf32> -> vector<8x32xf32>
    %63 = arith.addf %58, %62 : vector<8x32xf32>
    %64 = vector.broadcast %0 : vector<1x32xf32> to vector<8x32xf32>
    %65 = arith.addf %63, %64 : vector<8x32xf32>
    %cst_39 = arith.constant 0.000000e+00 : f32
    %66 = vector.broadcast %cst_39 : f32 to vector<8x32xf32>
    %67 = arith.maximumf %65, %66 : vector<8x32xf32>
    %cst_40 = arith.constant dense<0.000000e+00> : vector<8x16xf32>
    %68 = tpu.matmul %67, %61, %cst_40 {dimension_numbers = #tpu.dot_dimension_numbers<[1], [0], [0], [1], [0, 0, 1, 1], [], []>} : vector<8x32xf32>, vector<32x16xf32>, vector<8x16xf32> -> vector<8x16xf32>
    %69 = vector.broadcast %1 : vector<1x16xf32> to vector<8x16xf32>
    %70 = arith.addf %68, %69 : vector<8x16xf32>
    %cst_41 = arith.constant dense<0xFF800000> : vector<8xf32>
    %71 = vector.multi_reduction <maximumf>, %70, %cst_41 [1] : vector<8x16xf32> to vector<8xf32>
    %72 = vector.shape_cast %71 : vector<8xf32> to vector<8x1xf32>
    %73 = vector.broadcast %72 : vector<8x1xf32> to vector<8x16xf32>
    %74 = arith.subf %70, %73 : vector<8x16xf32>
    %75 = math.exp %74 : vector<8x16xf32>
    %cst_42 = arith.constant dense<0.000000e+00> : vector<8xf32>
    %76 = vector.multi_reduction <add>, %75, %cst_42 [1] : vector<8x16xf32> to vector<8xf32>
    %77 = vector.shape_cast %76 : vector<8xf32> to vector<8x1xf32>
    %78 = math.log %77 : vector<8x1xf32>
    %79 = vector.broadcast %78 : vector<8x1xf32> to vector<8x16xf32>
    %80 = arith.subf %74, %79 : vector<8x16xf32>
    %c0_43 = arith.constant 0 : index
    %c0_44 = arith.constant 0 : index
    %81 = vector.load %arg13[%c0_43, %c0_44] : memref<8x16xf32, #tpu.memory_space<vmem>>, vector<8x16xf32>
    tpu.vector_store %arg13[%c0_43, %c0_44], %80 {strides = array<i32>} : memref<8x16xf32, #tpu.memory_space<vmem>>, vector<8x16xf32>,
    %cst_45 = arith.constant dense<0.000000e+00> : vector<8x32xf32>
    %82 = tpu.matmul %38, %60, %cst_45 {dimension_numbers = #tpu.dot_dimension_numbers<[1], [0], [0], [1], [0, 0, 1, 1], [], []>} : vector<8x16xf32>, vector<16x32xf32>, vector<8x32xf32> -> vector<8x32xf32>
    %83 = arith.addf %58, %82 : vector<8x32xf32>
    %84 = vector.broadcast %0 : vector<1x32xf32> to vector<8x32xf32>
    %85 = arith.addf %83, %84 : vector<8x32xf32>
    %cst_46 = arith.constant 0.000000e+00 : f32
    %86 = vector.broadcast %cst_46 : f32 to vector<8x32xf32>
    %87 = arith.maximumf %85, %86 : vector<8x32xf32>
    %cst_47 = arith.constant dense<0.000000e+00> : vector<8x16xf32>
    %88 = tpu.matmul %87, %61, %cst_47 {dimension_numbers = #tpu.dot_dimension_numbers<[1], [0], [0], [1], [0, 0, 1, 1], [], []>} : vector<8x32xf32>, vector<32x16xf32>, vector<8x16xf32> -> vector<8x16xf32>
    %89 = vector.broadcast %1 : vector<1x16xf32> to vector<8x16xf32>
    %90 = arith.addf %88, %89 : vector<8x16xf32>
    %cst_48 = arith.constant dense<0xFF800000> : vector<8xf32>
    %91 = vector.multi_reduction <maximumf>, %90, %cst_48 [1] : vector<8x16xf32> to vector<8xf32>
    %92 = vector.shape_cast %91 : vector<8xf32> to vector<8x1xf32>
    %93 = vector.broadcast %92 : vector<8x1xf32> to vector<8x16xf32>
    %94 = arith.subf %90, %93 : vector<8x16xf32>
    %95 = math.exp %94 : vector<8x16xf32>
    %cst_49 = arith.constant dense<0.000000e+00> : vector<8xf32>
    %96 = vector.multi_reduction <add>, %95, %cst_49 [1] : vector<8x16xf32> to vector<8xf32>
    %97 = vector.shape_cast %96 : vector<8xf32> to vector<8x1xf32>
    %98 = math.log %97 : vector<8x1xf32>
    %99 = vector.broadcast %98 : vector<8x1xf32> to vector<8x16xf32>
    %100 = arith.subf %94, %99 : vector<8x16xf32>
    %c0_50 = arith.constant 0 : index
    %c0_51 = arith.constant 0 : index
    %101 = vector.load %arg14[%c0_50, %c0_51] : memref<8x16xf32, #tpu.memory_space<vmem>>, vector<8x16xf32>
    tpu.vector_store %arg14[%c0_50, %c0_51], %100 {strides = array<i32>} : memref<8x16xf32, #tpu.memory_space<vmem>>, vector<8x16xf32>,
    return
  }
  func.func @transform_0(%arg0: i32) -> (i32, i32) {
    %c0_i32 = arith.constant 0 : i32
    %c0_i32_0 = arith.constant 0 : i32
    return %arg0, %c0_i32 : i32, i32
  }
  func.func @transform_1(%arg0: i32) -> (i32, i32) {
    %c0_i32 = arith.constant 0 : i32
    %c0_i32_0 = arith.constant 0 : i32
    return %arg0, %c0_i32 : i32, i32
  }
  func.func @transform_2(%arg0: i32) -> (i32, i32) {
    %c0_i32 = arith.constant 0 : i32
    %c0_i32_0 = arith.constant 0 : i32
    return %arg0, %c0_i32 : i32, i32
  }
  func.func @transform_3(%arg0: i32) -> (i32, i32) {
    %c0_i32 = arith.constant 0 : i32
    %c0_i32_0 = arith.constant 0 : i32
    return %arg0, %c0_i32 : i32, i32
  }
  func.func @transform_4(%arg0: i32) -> (i32, i32, i32) {
    %c0_i32 = arith.constant 0 : i32
    %c0_i32_0 = arith.constant 0 : i32
    %c0_i32_1 = arith.constant 0 : i32
    %c0_i32_2 = arith.constant 0 : i32
    return %c0_i32, %c0_i32_0, %c0_i32_1 : i32, i32, i32
  }
  func.func @transform_5(%arg0: i32) -> (i32, i32) {
    %c0_i32 = arith.constant 0 : i32
    %c0_i32_0 = arith.constant 0 : i32
    %c0_i32_1 = arith.constant 0 : i32
    return %c0_i32, %c0_i32_0 : i32, i32
  }
  func.func @transform_6(%arg0: i32) -> (i32, i32) {
    %c0_i32 = arith.constant 0 : i32
    %c0_i32_0 = arith.constant 0 : i32
    %c0_i32_1 = arith.constant 0 : i32
    return %c0_i32, %c0_i32_0 : i32, i32
  }
  func.func @transform_7(%arg0: i32) -> (i32, i32) {
    %c0_i32 = arith.constant 0 : i32
    %c0_i32_0 = arith.constant 0 : i32
    %c0_i32_1 = arith.constant 0 : i32
    return %c0_i32, %c0_i32_0 : i32, i32
  }
  func.func @transform_8(%arg0: i32) -> (i32, i32) {
    %c0_i32 = arith.constant 0 : i32
    %c0_i32_0 = arith.constant 0 : i32
    return %arg0, %c0_i32 : i32, i32
  }
  func.func @transform_9(%arg0: i32) -> (i32, i32) {
    %c0_i32 = arith.constant 0 : i32
    %c0_i32_0 = arith.constant 0 : i32
    return %arg0, %c0_i32 : i32, i32
  }
  func.func @transform_10(%arg0: i32) -> (i32, i32) {
    %c0_i32 = arith.constant 0 : i32
    %c0_i32_0 = arith.constant 0 : i32
    return %arg0, %c0_i32 : i32, i32
  }
  func.func @transform_11(%arg0: i32) -> (i32, i32) {
    %c0_i32 = arith.constant 0 : i32
    %c0_i32_0 = arith.constant 0 : i32
    return %arg0, %c0_i32 : i32, i32
  }
  func.func @transform_12(%arg0: i32) -> (i32, i32) {
    %c0_i32 = arith.constant 0 : i32
    %c0_i32_0 = arith.constant 0 : i32
    return %arg0, %c0_i32 : i32, i32
  }
  func.func @transform_13(%arg0: i32) -> (i32, i32) {
    %c0_i32 = arith.constant 0 : i32
    %c0_i32_0 = arith.constant 0 : i32
    return %arg0, %c0_i32 : i32, i32
  }
}

</mosaic_0001>

<bundles_post_ra>
// kernel: tpu_custom_call.1
= control target key start
LH: loop header
LB: loop body
LE: loop exit
PB: predicated region body
PF: predicated region fallthrough
CT: control target
= control target key end

     0   :  { %s2780_s0 = inlined_call_operand.hbm [shape: f32[16,16], index: 0, kind: input, shape index: {}]   ;;  %s2781_s1 = inlined_call_operand.hbm [shape: f32[16,16], index: 1, kind: input, shape index: {}]   ;;  %s2782_s2 = inlined_call_operand.hbm [shape: f32[16,16], index: 2, kind: input, shape index: {}]   ;;  %s2783_s3 = inlined_call_operand.hbm [shape: f32[16,16], index: 3, kind: input, shape index: {}]   ;;  %s2784_s4 = inlined_call_operand.vmem [shape: f32[3,16,32], index: 4, kind: input, shape index: {}]   ;;  %s2785_s5 = inlined_call_operand.vmem [shape: f32[1,32], index: 5, kind: input, shape index: {}]   ;;  %s2786_s6 = inlined_call_operand.vmem [shape: f32[32,16], index: 6, kind: input, shape index: {}]   ;;  %s2787_s7 = inlined_call_operand.vmem [shape: f32[1,16], index: 7, kind: input, shape index: {}]   ;;  %s2788_s8 = inlined_call_operand.hbm [shape: f32[16,16], index: 8, kind: output, shape index: {0}]   ;;  %s2789_s9 = inlined_call_operand.hbm [shape: f32[16,16], index: 9, kind: output, shape index: {1}]   ;;  %s2790_s10 = inlined_call_operand.hbm [shape: f32[16,16], index: 10, kind: output, shape index: {2}]   ;;  %s2791_s11 = inlined_call_operand.hbm [shape: f32[16,16], index: 11, kind: output, shape index: {3}]   ;;  %s2792_s12 = inlined_call_operand.hbm [shape: f32[16,16], index: 12, kind: output, shape index: {4}]   ;;  %s2793_s13 = inlined_call_operand.hbm [shape: f32[16,16], index: 13, kind: output, shape index: {5}]  }
   0x1   :  { %2815 = sst [smem:[#allocation32_spill]] %s2781_s1 }
   0x2   :  { %2816 = sst [smem:[#allocation33_spill]] %s2788_s8 }
   0x3   :  { %2817 = sst [smem:[#allocation34_spill]] %s2790_s10 }
   0x4   :  { %2818 = sst [smem:[#allocation35_spill]] %s2791_s11 }
   0x5   :  { %2819 = sst [smem:[#allocation36_spill]] %s2792_s12 }
   0x6   :  { %2820 = sst [smem:[#allocation37_spill]] %s2793_s13 }
   0x7   :  { %19 = vsyncpa [#allocation3], 0 }
   0x8   :  { %21 = vsyncpa [#allocation3 + $0x1], 0 }
   0x9   :  { %22 = vsyncpa [#allocation6], 0 }
   0xa   :  { %24 = vsyncpa [#allocation6 + $0x1], 0 }
   0xb   :  { %25 = vsyncpa [#allocation9], 0 }
   0xc   :  { %27 = vsyncpa [#allocation9 + $0x1], 0 }
   0xd   :  { %28 = vsyncpa [#allocation4], 0 }
   0xe   :  { %30 = vsyncpa [#allocation4 + $0x1], 0 }
   0xf   :  { %31 = vsyncpa [#allocation12], 0 }
  0x10   :  { %33 = vsyncpa [#allocation12 + $0x1], 0 }
  0x11   :  { %34 = vsyncpa [#allocation15], 0 }
  0x12   :  { %36 = vsyncpa [#allocation15 + $0x1], 0 }
  0x13   :  { %37 = vsyncpa [#allocation18], 0 }
  0x14   :  { %39 = vsyncpa [#allocation18 + $0x1], 0  ;;  %s2246_s25 = smov 0   ;;  %s2248_s26 = smov 0  }
  0x15   :  { %s2250_s27 = smov 0   ;;  %s2252_s28 = smov 0  }
  0x16 LB: > { %2821 = sst [smem:[#allocation26_spill]] %s2149_s25  ;;  %s2267_s29 = sadd.s32 4294967295, %s2161_s28   ;;  %s2161_s28 = sphi %s2252_s28, %s2858_s28   ;;  %s2157_s27 = sphi %s2250_s27, %s2860_s27   ;;  %s2153_s26 = sphi %s2248_s26, %s2862_s26   ;;  %s2149_s25 = sphi %s2246_s25, %s2861_s25  }
  0x17   : > { %2822 = sst [smem:[#allocation27_spill]] %s2157_s27  ;;  %s2794_s30 = sadd.s32 4294967294, %s2161_s28  }
  0x18   : > { %2823 = sst [smem:[#allocation28_spill]] %s2161_s28  ;;  %s2271_s14 = sadd.s32 1, %s2161_s28  }
  0x19   : > { %2824 = sst [smem:[#allocation29_spill]] %s2271_s14  ;;  %s52_s15 = sadd.s32 1, %s2157_s27 }
  0x1a   : > { %s49_s16 = ssub.s32 %s2161_s28, %s2271_s14  ;;  %p59_p0 = scmp.ne.s32.totalorder %s2157_s27, %s2153_s26 }
  0x1b   : > { %p50_p1 = scmp.eq.s32.totalorder %s49_s16, 0  ;;  %p60_p2 = scmp.eq.s32.totalorder %s2161_s28, 0 }
  0x1c   : > { %p65_p3 = scmp.ne.s32.totalorder %s2153_s26, %s2149_s25  ;;  %p66_p4 = scmp.eq.s32.totalorder %s2267_s29, 0 }
  0x1d   : > { %s2283_s17 = scalar_select %p50_p1, %s2157_s27, %s52_s15  }
  0x1e   : > { %p61_p5 = por %p60_p2, %p59_p0  ;;  %p2285_p6 = por %p66_p4, %p65_p3 }
  0x1f   : > { %2825 = sst [smem:[#allocation30_spill]] %s2283_s17  ;;  %p251_p7 = scmp.eq.s32.totalorder %s2267_s29, 1 }
  0x20   : > { %s2826_s18 = scalar_select %p2285_p6, 1, 0 }
  0x21   : > { %p257_p8 = scmp.eq.s32.totalorder %s2794_s30, 1  ;;  %p1754_p10 = scmp.lt.s32.totalorder %s2161_s28, 2 }
  0x22   : > { %p2294_p11 = por %p251_p7, %p59_p0  ;;  %s2303_s21 = sand.u32 1, %s2157_s27  }
  0x23   : > { %p2298_p12 = por %p257_p8, %p65_p3  ;;  %s2306_s22 = sshll.u32 %s2161_s28, 7 }
  0x24   : > { %s2827_s19 = scalar_select %p2294_p11, 1, 0 }
  0x25   : > { %s2828_s20 = scalar_select %p2298_p12, 1, 0 }
  0x26   : > { %s2309_s23 = sshll.u32 %s2303_s21, 3  ;;  %p2311_p13 = pnand %p1754_p10, %p61_p5 }
  0x27   : > { %2829 = sst [smem:[#allocation31_spill]] %s2828_s20  ;;  %s437_s15 = sand.u32 1, %s2161_s28  }
  0x28   : > { %s2830_s24 = scalar_select %p2311_p13, 1, 0 }
  0x29   : > { %s2831_s1 = sld [smem:[#allocation32_spill]]  ;;  %s441_s27 = scalar_lea.vmem [#allocation5], %s2309_s23 }
  0x2a   : > { %s448_s14 = sshll.u32 %s441_s27, 4  ;;  %s2326_s20 = scalar_lea.sflag [#allocation6], %s437_s15  ;;  %s2323_s14 = int_to_ptr.vmem [resolvable:$true] %s448_s14 }
  0x2b   : > { %p2332_p2 = pneg %p2311_p13 }
  0x2f   : > { %s2320_s17 = scalar_lea.hbm %s2831_s1, %s2306_s22  ;;  %s1820_s27 = scalar_lea.hbm %s2831_s1, 256 }
  0x30   : > { %s1815_s25 = scalar_lea.hbm %s2320_s17, 128  ;;  %p1821_p5 = scmp.lt.u32.totalorder %s2320_s17, %s2831_s1 }
  0x31   : > { %p1816_p1 = scmp.ne.s32.totalorder %s2320_s17, %s1815_s25  ;;  %p1822_p7 = scmp.lt.u32.totalorder %s1820_s27, %s1815_s25 }
  0x32   : > { %p1824_p10 = scmp.lt.u32.totalorder %s1815_s25, %s2320_s17 }
  0x33   : > { %p1818_p3 = pnand %p2332_p2, %p1816_p1  ;;  %p1823_p8 = por %p1822_p7, %p1821_p5 }
  0x35   : > { %p1819_p4 = pneg %p1818_p3  ;;  %p1825_p9 = por %p1824_p10, %p1823_p8 }
  0x37   : > { %p1826_p0 = pnand %p1825_p9, %p1819_p4 }
  0x39   : > { %1829 = shalt.err (!%p1826_p0)
}
  0x3a   : > { %s1830_s15 = scalar_lea.vmem %s2323_s14, 128  ;;  %s2163_s30 = smov [#allocation5]  }
  0x3b   : > { %p1831_p1 = scmp.ne.s32.totalorder %s2323_s14, %s1830_s15  ;;  %s1835_s16 = sshll.u32 %s2163_s30, 4  ;;  %s1836_s16 = int_to_ptr.vmem [resolvable:$false] %s1835_s16 }
  0x3c   : > { %s1837_s10 = scalar_lea.vmem %s1836_s16, 256  ;;  %p1838_p11 = scmp.lt.s32.totalorder %s2323_s14, %s1836_s16 }
  0x3d   : > { %p1833_p3 = pnand %p1831_p1, %p2332_p2  ;;  %p1839_p6 = scmp.lt.s32.totalorder %s1837_s10, %s1830_s15 }
  0x3f   : > { %p1834_p12 = pneg %p1833_p3  ;;  %p1840_p5 = por %p1839_p6, %p1838_p11 }
  0x41   : > { %p1841_p7 = pnand %p1840_p5, %p1834_p12 }
  0x43   : > { %1844 = shalt.err (!%p1841_p7)
}
  0x44   : > { %1728 = dma.hbm_to_vmem [thread:$0]  (!%p2311_p13), %s2320_s17, 128, %s2323_s14, %s2326_s20  }
  0x45   : > { %p489_p9 = scmp.lt.s32.totalorder %s2161_s28, 3  ;;  %s2361_s27 = scalar_lea.hbm %s2780_s0, %s2306_s22 }
  0x46   : > { %p2833_p6 = scmp.ge.s32.totalorder %s2161_s28, 1  ;;  %s423_s30 = scalar_lea.vmem [#allocation2], %s2309_s23 }
  0x47   : > { %s430_s16 = sshll.u32 %s423_s30, 4  ;;  %s420_s10 = scalar_lea.sflag [#allocation3], %s2303_s21  ;;  %s431_s16 = int_to_ptr.vmem [resolvable:$true] %s430_s16 }
  0x48   : > { %p2365_p11 = pnand %p2833_p6, %p489_p9  ;;  %s1845_s14 = scalar_lea.hbm %s2361_s27, 128 }
  0x49   : > { %p1846_p12 = scmp.ne.s32.totalorder %s2361_s27, %s1845_s14  ;;  %s1850_s25 = scalar_lea.hbm %s2780_s0, 256 }
  0x4a   : > { %s2834_s15 = scalar_select %p2365_p11, 1, 0 }
  0x4b   : > { %p1848_p0 = pnand %p1846_p12, %p2332_p2  ;;  %p1851_p8 = scmp.lt.u32.totalorder %s2361_s27, %s2780_s0 }
  0x4c   : > { %p1852_p10 = scmp.lt.u32.totalorder %s1850_s25, %s1845_s14  ;;  %p1854_p3 = scmp.lt.u32.totalorder %s1845_s14, %s2361_s27 }
  0x4d   : > { %p1849_p4 = pneg %p1848_p0 }
  0x4e   : > { %p1853_p1 = por %p1852_p10, %p1851_p8 }
  0x50   : > { %p1855_p5 = por %p1854_p3, %p1853_p1 }
  0x52   : > { %p1856_p7 = pnand %p1855_p5, %p1849_p4 }
  0x54   : > { %1859 = shalt.err (!%p1856_p7)
}
  0x55   : > { %s1860_s30 = scalar_lea.vmem %s431_s16, 128  ;;  %s2164_s8 = smov [#allocation2]  }
  0x56   : > { %p1861_p9 = scmp.ne.s32.totalorder %s431_s16, %s1860_s30  ;;  %s1865_s11 = sshll.u32 %s2164_s8, 4  ;;  %s1866_s11 = int_to_ptr.vmem [resolvable:$false] %s1865_s11 }
  0x57   : > { %s1867_s17 = scalar_lea.vmem %s1866_s11, 256  ;;  %p1868_p0 = scmp.lt.s32.totalorder %s431_s16, %s1866_s11 }
  0x58   : > { %p1863_p6 = pnand %p1861_p9, %p2332_p2  ;;  %p1869_p11 = scmp.lt.s32.totalorder %s1867_s17, %s1860_s30 }
  0x5a   : > { %p1864_p12 = pneg %p1863_p6  ;;  %p1870_p13 = por %p1869_p11, %p1868_p0 }
  0x5c   : > { %p1871_p8 = pnand %p1870_p13, %p1864_p12 }
  0x5e   : > { %1874 = shalt.err (!%p1871_p8)
}
  0x5f   : > { %p2835_p10 = scmp.ne.s32.totalorder %s2830_s24, 0  ;;  %s2392_s14 = scalar_lea.hbm %s2782_s2, %s2306_s22 }
  0x60   : > { %s459_s8 = scalar_lea.vmem [#allocation7], %s2309_s23  ;;  %s1875_s12 = scalar_lea.hbm %s2392_s14, 128 }
  0x61   : > { %1725 = dma.hbm_to_vmem [thread:$0]  (!%p2835_p10), %s2361_s27, 128, %s431_s16, %s420_s10  }
  0x62   : > { %s466_s11 = sshll.u32 %s459_s8, 4  ;;  %p1876_p13 = scmp.ne.s32.totalorder %s2392_s14, %s1875_s12  ;;  %s467_s11 = int_to_ptr.vmem [resolvable:$true] %s466_s11 }
  0x63   : > { %s1880_s27 = scalar_lea.hbm %s2782_s2, 256  ;;  %p1881_p1 = scmp.lt.u32.totalorder %s2392_s14, %s2782_s2 }
  0x64   : > { %p1878_p11 = pnand %p1876_p13, %p2332_p2  ;;  %p1882_p3 = scmp.lt.u32.totalorder %s1880_s27, %s1875_s12 }
  0x65   : > { %p1884_p7 = scmp.lt.u32.totalorder %s1875_s12, %s2392_s14 }
  0x66   : > { %p1879_p4 = pneg %p1878_p11  ;;  %p1883_p5 = por %p1882_p3, %p1881_p1 }
  0x68   : > { %p1885_p9 = por %p1884_p7, %p1883_p5 }
  0x6a   : > { %p1886_p6 = pnand %p1885_p9, %p1879_p4 }
  0x6c   : > { %1889 = shalt.err (!%p1886_p6)
}
  0x6d   : > { %s1890_s17 = scalar_lea.vmem %s467_s11, 128  ;;  %s2165_s1 = smov [#allocation7]  }
  0x6e   : > { %p1891_p12 = scmp.ne.s32.totalorder %s467_s11, %s1890_s17  ;;  %s1895_s28 = sshll.u32 %s2165_s1, 4  ;;  %s1896_s28 = int_to_ptr.vmem [resolvable:$false] %s1895_s28 }
  0x6f   : > { %s1897_s8 = scalar_lea.vmem %s1896_s28, 256  ;;  %p1898_p13 = scmp.lt.s32.totalorder %s467_s11, %s1896_s28 }
  0x70   : > { %p1893_p0 = pnand %p1891_p12, %p2332_p2  ;;  %p1899_p11 = scmp.lt.s32.totalorder %s1897_s8, %s1890_s17 }
  0x72   : > { %p1894_p8 = pneg %p1893_p0  ;;  %p1900_p10 = por %p1899_p11, %p1898_p13 }
  0x74   : > { %p1901_p1 = pnand %p1900_p10, %p1894_p8 }
  0x76   : > { %1904 = shalt.err (!%p1901_p1)
}
  0x77   : > { %p2836_p3 = scmp.ne.s32.totalorder %s2830_s24, 0  ;;  %s2417_s30 = scalar_lea.hbm %s2783_s3, %s2306_s22 }
  0x78   : > { %s477_s27 = scalar_lea.vmem [#allocation8], %s2309_s23  ;;  %s474_s10 = scalar_lea.sflag [#allocation9], %s2303_s21 }
  0x79   : > { %1731 = dma.hbm_to_vmem [thread:$0]  (!%p2836_p3), %s2392_s14, 128, %s467_s11, %s2326_s20  }
  0x7a   : > { %s484_s16 = sshll.u32 %s477_s27, 4  ;;  %s1905_s17 = scalar_lea.hbm %s2417_s30, 128  ;;  %s485_s16 = int_to_ptr.vmem [resolvable:$true] %s484_s16 }
  0x7b   : > { %p1906_p10 = scmp.ne.s32.totalorder %s2417_s30, %s1905_s17  ;;  %s1910_s14 = scalar_lea.hbm %s2783_s3, 256 }
  0x7c   : > { %p1911_p7 = scmp.lt.u32.totalorder %s2417_s30, %s2783_s3  ;;  %p1912_p9 = scmp.lt.u32.totalorder %s1910_s14, %s1905_s17 }
  0x7d   : > { %p1908_p4 = pnand %p1906_p10, %p2332_p2  ;;  %p1914_p12 = scmp.lt.u32.totalorder %s1905_s17, %s2417_s30 }
  0x7e   : > { %p1913_p6 = por %p1912_p9, %p1911_p7 }
  0x7f   : > { %p1909_p5 = pneg %p1908_p4 }
  0x80   : > { %p1915_p0 = por %p1914_p12, %p1913_p6 }
  0x82   : > { %p1916_p8 = pnand %p1915_p0, %p1909_p5 }
  0x84   : > { %1919 = shalt.err (!%p1916_p8)
}
  0x85   : > { %s1920_s21 = scalar_lea.vmem %s485_s16, 128  ;;  %s2166_s23 = smov [#allocation8]  }
  0x86   : > { %p1921_p13 = scmp.ne.s32.totalorder %s485_s16, %s1920_s21  ;;  %s1925_s28 = sshll.u32 %s2166_s23, 4  ;;  %s1926_s28 = int_to_ptr.vmem [resolvable:$false] %s1925_s28 }
  0x87   : > { %s1927_s8 = scalar_lea.vmem %s1926_s28, 256  ;;  %p1928_p10 = scmp.lt.s32.totalorder %s485_s16, %s1926_s28 }
  0x88   : > { %p1923_p11 = pnand %p1921_p13, %p2332_p2  ;;  %p1929_p4 = scmp.lt.s32.totalorder %s1927_s8, %s1920_s21 }
  0x8a   : > { %p1924_p1 = pneg %p1923_p11  ;;  %p1930_p3 = por %p1929_p4, %p1928_p10 }
  0x8c   : > { %p1931_p7 = pnand %p1930_p3, %p1924_p1 }
  0x8e   : > { %1934 = shalt.err (!%p1931_p7)
}
  0x8f   : > { %p2837_p9 = scmp.ne.s32.totalorder %s2830_s24, 0  ;;  %p2838_p5 = scmp.ne.s32.totalorder %s2834_s15, 0 }
  0x90   : > { %s2441_s13 = sand.u32 (!%p2838_p5), 1, %s2153_s26   ;;  %p2839_p2 = scmp.ne.s32.totalorder (!%p2838_p5), %s2826_s18, 0 }
  0x91   : > { %1734 = dma.hbm_to_vmem [thread:$0]  (!%p2837_p9), %s2417_s30, 128, %s485_s16, %s474_s10  }
  0x92   : > { %493 = sbr.rel (%p2838_p5) target bundleno = 956 (0x3bc), region = 52  ;;  %s2444_s12 = sshll.u32 (!%p2838_p5), %s2441_s13, 3 }
  0x93   : > { %s496_s25 = scalar_lea.sflag (!%p2838_p5), [#allocation3], %s2441_s13  ;;  %s499_s27 = scalar_lea.vmem (!%p2838_p5), [#allocation2], %s2444_s12 }
  0x99   : > { %2120 = dma.done.wait (%p2839_p2), %s496_s25, 128  }
  0x9a   : > { %2122 = vsyncadd (%p2839_p2), %s496_s25, 4294967168  ;;  %s2453_s24 = sand.u32 1, %s2267_s29   ;;  %s508_s30 = scalar_lea.vmem [#allocation5], %s2444_s12 }
  0x9b   : > { %s505_s15 = scalar_lea.sflag [#allocation6], %s2453_s24 }
  0x9c   : > { %2124 = dma.done.wait (%p2839_p2), %s505_s15, 256  }
  0x9d   : > { %2126 = vsyncadd (%p2839_p2), %s505_s15, 4294967040  ;;  %s517_s16 = scalar_lea.vmem [#allocation7], %s2444_s12  ;;  %s523_s10 = scalar_lea.sflag [#allocation9], %s2441_s13 }
  0x9e   : > { %s526_s17 = scalar_lea.vmem [#allocation8], %s2444_s12 }
  0x9f   : > { %2128 = dma.done.wait (%p2839_p2), %s523_s10, 128  }
  0xa0   : > { %2130 = vsyncadd (%p2839_p2), %s523_s10, 4294967168  ;;  %v2167_v0 = vmov 0.0|0.0   ;;  %vm2168_vm0 = vmmov 0   ;;  %v2169_v1 = vmov 0.0   ;;  %v1579_v2 = vld [vmem:[%s2784_s4 + $0x10] sm:$0xff]  ;;  %v1580_v3 = vld [vmem:[%s2784_s4 + $0x18] sm:$0xff] }
  0xa1   : > { %1677 = vmatprep.subr.bf16.mxu1 %v2167_v0  ;;  %1680 = vmatprep.subr.bf16.mxu0 %v2167_v0  ;;  %v668_v4 = vld [vmem:[%s2784_s4] sm:$0xff]  ;;  %v1678_v5 = vpack.c.bf16 %v1580_v3, %v1579_v2  ;;  %v669_v6 = vld [vmem:[%s2784_s4 + $0x8] sm:$0xff]  ;;  %vm612_vm1 = vcmask 130048   ;;  %v626_v10 = vld [vmem:[%s508_s30] sm:$0xff]  ;;  %vm914_vm2 = vcmask 261120   ;;  %s594_s23 = scalar_lea.vmem [#allocation14], %s2444_s12 }
  0xa2   : > { %1631 = vmatprep.mubr.msk.f32.mxu1 %vm2168_vm0, %v2169_v1  ;;  %1638 = vmatprep.mubr.msk.f32.mxu0 %vm2168_vm0, %v2169_v1  ;;  %v1681_v7 = vpack.c.bf16 %v669_v6, %v668_v4  ;;  %v1583_v8 = vld [vmem:[%s2784_s4 + $0x20] sm:$0xff]  ;;  %v1584_v9 = vld [vmem:[%s2784_s4 + $0x28] sm:$0xff]  ;;  %v654_v14 = vld [vmem:[%s526_s17] sm:$0xff]  ;;  %v627_v21 = vsel %vm612_vm1, %v626_v10, -inf  ;;  %s580_s28 = scalar_lea.vmem [#allocation11], %s2444_s12  ;;  %s573_s8 = scalar_lea.vmem [#allocation10], %s2444_s12 }
  0xa3   : > { %1679 = vmatpush3.bf16.msra.mxu1 %v1678_v5  ;;  %v1684_v11 = vpack.c.bf16 %v1584_v9, %v1583_v8  ;;  %v2490_v12 = vld [vmem:[%s499_s27] sm:$0xff]  ;;  %v824_v18 = vld [vmem:[%s2786_s6 + $0x10] sm:$0xff]  ;;  %v825_v19 = vld [vmem:[%s2786_s6 + $0x18] sm:$0xff]  ;;  %628 = vmax.xlane.f32.xlu0 %v627_v21  ;;  %v655_v23 = vsel %vm612_vm1, %v654_v14, -inf  ;;  %s2812_s25 = scalar_lea.vmem [#allocation13], %s2444_s12  ;;  %s2574_s15 = sshll.u32 %s2267_s29, 7 }
  0xa4   : > { %1682 = vmatpush3.bf16.msra.mxu0 %v1681_v7  ;;  %1683 = vmatprep.subr.bf16.mxu1 %v2167_v0  ;;  %v640_v13 = vld [vmem:[%s517_s16] sm:$0xff]  ;;  %v1690_v20 = vpack.c.bf16 %v825_v19, %v824_v18  ;;  %v613_v22 = vsel %vm612_vm1, %v2490_v12, -inf  ;;  %s2580_s16 = scalar_lea.hbm %s2789_s9, %s2574_s15  ;;  %s1215_s10 = sshll.u32 %s580_s28, 4  ;;  %s1216_s10 = int_to_ptr.vmem [resolvable:$true] %s1215_s10 }
  0xa5   : > { %1692 = vmatprep.subr.bf16.mxu0 %v2167_v0  ;;  %v822_v15 = vld [vmem:[%s2786_s6] sm:$0xff]  ;;  %v823_v16 = vld [vmem:[%s2786_s6 + $0x8] sm:$0xff]  ;;  %614 = vmax.xlane.f32.xlu1 %v613_v22  ;;  %v641_v24 = vsel %vm612_vm1, %v640_v13, -inf  ;;  %s2811_s17 = scalar_lea.sflag [#allocation12], %s2453_s24  ;;  %s1935_s1 = scalar_lea.vmem %s1216_s10, 128 }
  0xa6   : > { %1632 = vmatmul.mubr.msk.f32.vlgmr.msra.gmra.mrb[0].mxu1 %vm612_vm1, %v626_v10  ;;  %v1687_v17 = vpack.c.bf16 %v823_v16, %v822_v15  ;;  %v1586_v30 = vld [vmem:[%s2785_s5] ss:$0 sm:$0xff]  ;;  %p1936_p3 = scmp.ne.s32.totalorder %s1216_s10, %s1935_s1  ;;  %p2840_p6 = scmp.ne.s32.totalorder %s2827_s19, 0 }
  0xa7   : > { %1639 = vmatmul.mubr.msk.f32.vlgmr.msra.gmra.mrb[0].mxu0 %vm612_vm1, %v2490_v12  ;;  %1685 = vmatpush3.bf16.msra.mxu1 %v1684_v11  ;;  %v1587_v53 = vld [vmem:[%s2787_s7] ss:$0 sm:$0xff]  ;;  %s2170_s20 = smov [#allocation11]  }
  0xa8   : > { %1694 = vmatpush3.bf16.msra.mxu0 %v1684_v11  ;;  %1645 = vmatprep.mubr.msk.f32.mxu1 %vm2168_vm0, %v2169_v1  ;;  %p1937_p12 = pnand %p1936_p3, %p2840_p6  ;;  %s1939_s14 = sshll.u32 %s2170_s20, 4  ;;  %s1940_s14 = int_to_ptr.vmem [resolvable:$false] %s1939_s14 }
  0xa9   : > { %1663 = vmatprep.mubr.msk.f32.mxu0 %vm2168_vm0, %v2169_v1  ;;  %1686 = vmatprep.subr.bf16.mxu1 %v2167_v0  ;;  %s1941_s11 = scalar_lea.vmem %s1940_s14, 256  ;;  %p1942_p8 = scmp.lt.s32.totalorder %s1216_s10, %s1940_s14 }
  0xaa   : > { %1646 = vmatmul.mubr.msk.f32.vlgmr.msra.gmra.mrb[2].mxu1 %vm612_vm1, %v640_v13  ;;  %1695 = vmatprep.subr.bf16.mxu0 %v2167_v0  ;;  %p1938_p0 = pneg %p1937_p12  ;;  %p1943_p13 = scmp.lt.s32.totalorder %s1941_s11, %s1935_s1 }
  0xab   : > { %1664 = vmatmul.mubr.msk.f32.vlgmr.msra.gmra.mrb[2].mxu0 %vm612_vm1, %v654_v14  ;;  %1656 = vmatprep.mubr.msk.f32.mxu1 %vm2168_vm0, %v2169_v1 }
  0xac   : > { %1674 = vmatprep.mubr.msk.f32.mxu0 %vm2168_vm0, %v2169_v1  ;;  %1688 = vmatpush3.bf16.msra.mxu1 %v1687_v17  ;;  %p1944_p11 = por %p1943_p13, %p1942_p8 }
  0xad   : > { %1697 = vmatpush3.bf16.msra.mxu0 %v1687_v17  ;;  %1689 = vmatprep.subr.bf16.mxu1 %v2167_v0 }
  0xae   : > { %1698 = vmatprep.subr.bf16.mxu0 %v2167_v0  ;;  %656 = vmax.xlane.f32.xlu0 %v655_v23  ;;  %p1945_p1 = pnand %p1944_p11, %p1938_p0 }
  0xaf   : > { %642 = vmax.xlane.f32.xlu1 %v641_v24 }
  0xb0   : > { %1691 = vmatpush3.bf16.msra.mxu1 %v1690_v20 }
  0xb1   : > { %1700 = vmatpush3.bf16.msra.mxu0 %v1690_v20 }
 0x130   : > { %v629_v41 = vpop.xlane.xlu0 %628 }
 0x131   : > { %v2525_v44 = vsub.f32 %v626_v10, %v629_v41 }
 0x132   : > { %v615_v42 = vpop.xlane.xlu1 %614 }
 0x133   : > { %v631_v47 = vmul.f32 1.442695, %v2525_v44  ;;  %v2531_v48 = vsub.f32 %v2490_v12, %v615_v42 }
 0x135   : > { %1791 = vpow2.f32 %v631_v47  ;;  %v617_v51 = vmul.f32 1.442695, %v2531_v48 }
 0x13b   : > { %v657_v43 = vpop.xlane.xlu0 %656 }
 0x13c   : > { %v2527_v45 = vsub.f32 %v654_v14, %v657_v43  ;;  %v643_v46 = vpop.xlane.xlu1 %642 }
 0x13d   : > { %v2534_v50 = vsub.f32 %v640_v13, %v643_v46 }
 0x13e   : > { %v659_v49 = vmul.f32 1.442695, %v2527_v45 }
 0x13f   : > { %v645_v52 = vmul.f32 1.442695, %v2534_v50  ;;  %v1792_v58 = vpop.eup %1791 }
 0x140   : > { %1793 = vpow2.f32 %v659_v49  ;;  %v633_v0 = vsel %vm612_vm1, %v1792_v58, 0.0 }
 0x141   : > { %1795 = vpow2.f32 %v617_v51 }
 0x142   : > { %1797 = vpow2.f32 %v645_v52 }
 0x14a   : > { %v1794_v61 = vpop.eup %1793 }
 0x14b   : > { %v1796_v1 = vpop.eup %1795  ;;  %v661_v2 = vsel %vm612_vm1, %v1794_v61, 0.0 }
 0x14c   : > { %v1798_v3 = vpop.eup %1797  ;;  %v619_v4 = vsel %vm612_vm1, %v1796_v1, 0.0 }
 0x14d   : > { %v647_v5 = vsel %vm612_vm1, %v1798_v3, 0.0 }
 0x179   : > { %v742_v25 = vpop.f32.mrb[0].mxu1 }
 0x17a   : > { %v815_v26 = vpop.f32.mrb[0].mxu0  ;;  %v1633_v27 = vpop.f32.mrb[1].mxu1 }
 0x17b   : > { %v816_v28 = vadd.f32 %v815_v26, %v742_v25  ;;  %v1640_v29 = vpop.f32.mrb[1].mxu0 }
 0x17d   : > { %v895_v31 = vpop.f32.mrb[2].mxu1 }
 0x17e   : > { %v899_v32 = vadd.f32 %v895_v31, %v816_v28  ;;  %v1070_v33 = vpop.f32.mrb[2].mxu0  ;;  %v1647_v34 = vpop.f32.mrb[3].mxu1 }
 0x17f   : > { %v1074_v35 = vadd.f32 %v1070_v33, %v816_v28  ;;  %v1665_v36 = vpop.f32.mrb[3].mxu0 }
 0x180   : > { %v906_v37 = vadd.f32 %v1586_v30, %v899_v32 }
 0x181   : > { %v1075_v38 = vadd.f32 %v1586_v30, %v1074_v35 }
 0x182   : > { %v907_v39 = vmax.f32 %v906_v37, 0.0 }
 0x183   : > { %v1076_v40 = vmax.f32 %v1075_v38, 0.0 }
 0x184   : > { %1657 = vmatmul.mubr.msk.f32.vlgmr.msra.gmra.mrb[4].mxu1 %vm914_vm2, %v907_v39 }
 0x185   : > { %1675 = vmatmul.mubr.msk.f32.vlgmr.msra.gmra.mrb[4].mxu0 %vm914_vm2, %v1076_v40 }
 0x257   : > { %v984_v54 = vpop.f32.mrb[4].mxu1 }
 0x258   : > { %v985_v55 = vadd.f32 %v1587_v53, %v984_v54  ;;  %v1146_v56 = vpop.f32.mrb[4].mxu0  ;;  %v1658_v57 = vpop.f32.mrb[5].mxu1 }
 0x259   : > { %v1147_v59 = vadd.f32 %v1587_v53, %v1146_v56  ;;  %v1676_v60 = vpop.f32.mrb[5].mxu0 }
 0x25a   : > { %v988_v62 = vsel %vm612_vm1, %v985_v55, -inf }
 0x25b   : > { %v1150_v63 = vsel %vm612_vm1, %v1147_v59, -inf  ;;  %989 = vmax.xlane.f32.xlu0 %v988_v62 }
 0x25c   : > { %1151 = vmax.xlane.f32.xlu1 %v1150_v63 }
 0x25f   : > { %634 = vadd.xlane.f32.xlu0 %v633_v0 }
 0x260   : > { %662 = vadd.xlane.f32.xlu1 %v661_v2 }
 0x263   : > { %620 = vadd.xlane.f32.xlu0 %v619_v4 }
 0x264   : > { %648 = vadd.xlane.f32.xlu1 %v647_v5 }
 0x2e8   : > { %v990_v6 = vpop.xlane.xlu0 %989 }
 0x2e9   : > { %v1152_v7 = vpop.xlane.xlu1 %1151  ;;  %v2547_v8 = vsub.f32 %v985_v55, %v990_v6 }
 0x2ea   : > { %v2549_v9 = vsub.f32 %v1147_v59, %v1152_v7 }
 0x2eb   : > { %v992_v10 = vmul.f32 1.442695, %v2547_v8 }
 0x2ec   : > { %v1154_v11 = vmul.f32 1.442695, %v2549_v9  ;;  %v635_v12 = vpop.xlane.xlu0 %634 }
 0x2ed   : > { %1799 = vpow2.f32 %v992_v10  ;;  %v663_v13 = vpop.xlane.xlu1 %662 }
 0x2ee   : > { %1801 = vpow2.f32 %v1154_v11 }
 0x2ef   : > { %1803 = vlog2.f32 %v663_v13 }
 0x2f0   : > { %1805 = vlog2.f32 %v635_v12  ;;  %v621_v14 = vpop.xlane.xlu0 %620 }
 0x2f1   : > { %v649_v15 = vpop.xlane.xlu1 %648  ;;  %1807 = vlog2.f32 %v621_v14 }
 0x2f2   : > { %1809 = vlog2.f32 %v649_v15 }
 0x2f7   : > { %v1800_v16 = vpop.eup %1799 }
 0x2f8   : > { %v1802_v17 = vpop.eup %1801  ;;  %v994_v18 = vsel %vm612_vm1, %v1800_v16, 0.0 }
 0x2f9   : > { %v1804_v19 = vpop.eup %1803  ;;  %v1156_v20 = vsel %vm612_vm1, %v1802_v17, 0.0  ;;  %995 = vadd.xlane.f32.xlu0 %v994_v18 }
 0x2fa   : > { %v1806_v21 = vpop.eup %1805  ;;  %v665_v22 = vmul.f32 0.6931472, %v1804_v19  ;;  %1157 = vadd.xlane.f32.xlu1 %v1156_v20 }
 0x2fb   : > { %v1808_v23 = vpop.eup %1807  ;;  %v637_v24 = vmul.f32 0.6931472, %v1806_v21 }
 0x2fc   : > { %v1810_v25 = vpop.eup %1809  ;;  %v666_v26 = vsub.f32 %v2527_v45, %v665_v22  ;;  %v623_v27 = vmul.f32 0.6931472, %v1808_v23 }
 0x2fd   : > { %v638_v28 = vsub.f32 %v2525_v44, %v637_v24  ;;  %v651_v29 = vmul.f32 0.6931472, %v1810_v25 }
 0x2fe   : > { %v624_v30 = vsub.f32 %v2531_v48, %v623_v27  ;;  %667 = vst.msk [vmem:[%s594_s23] sm:$0xff] %vm612_vm1, %v666_v26 }
 0x2ff   : > { %v652_v31 = vsub.f32 %v2534_v50, %v651_v29  ;;  %639 = vst.msk [vmem:[%s580_s28] sm:$0xff] %vm612_vm1, %v638_v28 }
 0x300   : > { %625 = vst.msk [vmem:[%s573_s8] sm:$0xff] %vm612_vm1, %v624_v30 }
 0x301   : > { %653 = vst.msk [vmem:[%s2812_s25] sm:$0xff] %vm612_vm1, %v652_v31 }
 0x302   : > { %1948 = shalt.err (!%p1945_p1)
}
 0x303   : > { %s1949_s29 = scalar_lea.hbm %s2580_s16, 128  ;;  %s1953_s21 = scalar_lea.hbm %s2789_s9, 256 }
 0x304   : > { %p1950_p10 = scmp.ne.s32.totalorder %s2580_s16, %s1949_s29  ;;  %p1954_p9 = scmp.lt.u32.totalorder %s2580_s16, %s2789_s9 }
 0x305   : > { %p1955_p5 = scmp.lt.u32.totalorder %s1953_s21, %s1949_s29  ;;  %p1957_p3 = scmp.lt.u32.totalorder %s1949_s29, %s2580_s16 }
 0x306   : > { %p1951_p4 = pnand %p1950_p10, %p2840_p6 }
 0x307   : > { %p1956_p2 = por %p1955_p5, %p1954_p9 }
 0x308   : > { %p1952_p7 = pneg %p1951_p4 }
 0x309   : > { %p1958_p12 = por %p1957_p3, %p1956_p2 }
 0x30b   : > { %p1959_p0 = pnand %p1958_p12, %p1952_p7 }
 0x30d   : > { %1962 = shalt.err (!%p1959_p0)
}
 0x30e   : > { %1711 = dma.vmem_to_hbm [thread:$0]  (%p2840_p6), %s1216_s10, 128, %s2580_s16, %s2811_s17  }
 0x30f   : > { %s2841_s20 = sld [smem:[#allocation35_spill]]  ;;  %s1241_s11 = sshll.u32 %s594_s23, 4  ;;  %s1242_s11 = int_to_ptr.vmem [resolvable:$true] %s1241_s11 }
 0x310   : > { %s2814_s29 = scalar_lea.sflag [#allocation15], %s2453_s24  ;;  %s1963_s18 = scalar_lea.vmem %s1242_s11, 128 }
 0x311   : > { %p1964_p8 = scmp.ne.s32.totalorder %s1242_s11, %s1963_s18  ;;  %s2171_s22 = smov [#allocation14]  }
 0x312   : > { %s1967_s21 = sshll.u32 %s2171_s22, 4  ;;  %s1968_s21 = int_to_ptr.vmem [resolvable:$false] %s1967_s21 }
 0x313   : > { %p1965_p13 = pnand %p1964_p8, %p2840_p6  ;;  %s1969_s28 = scalar_lea.vmem %s1968_s21, 256 }
 0x314   : > { %p1970_p1 = scmp.lt.s32.totalorder %s1242_s11, %s1968_s21  ;;  %p1971_p10 = scmp.lt.s32.totalorder %s1969_s28, %s1963_s18 }
 0x315   : > { %s2606_s14 = scalar_lea.hbm %s2841_s20, %s2574_s15  ;;  %p1966_p11 = pneg %p1965_p13 }
 0x316   : > { %p1972_p4 = por %p1971_p10, %p1970_p1 }
 0x318   : > { %p1973_p7 = pnand %p1972_p4, %p1966_p11 }
 0x31a   : > { %1976 = shalt.err (!%p1973_p7)
}
 0x31b   : > { %s1977_s23 = scalar_lea.hbm %s2606_s14, 128  ;;  %s1981_s27 = scalar_lea.hbm %s2841_s20, 256 }
 0x31c   : > { %p1978_p9 = scmp.ne.s32.totalorder %s2606_s14, %s1977_s23  ;;  %p1982_p3 = scmp.lt.u32.totalorder %s2606_s14, %s2841_s20 }
 0x31d   : > { %p1983_p12 = scmp.lt.u32.totalorder %s1981_s27, %s1977_s23  ;;  %p1985_p8 = scmp.lt.u32.totalorder %s1977_s23, %s2606_s14 }
 0x31e   : > { %p1979_p5 = pnand %p1978_p9, %p2840_p6 }
 0x31f   : > { %p1984_p0 = por %p1983_p12, %p1982_p3 }
 0x320   : > { %p1980_p2 = pneg %p1979_p5 }
 0x321   : > { %p1986_p13 = por %p1985_p8, %p1984_p0 }
 0x323   : > { %p1987_p11 = pnand %p1986_p13, %p1980_p2 }
 0x325   : > { %1990 = shalt.err (!%p1987_p11)
}
 0x326   : > { %1713 = dma.vmem_to_hbm [thread:$0]  (%p2840_p6), %s1242_s11, 128, %s2606_s14, %s2814_s29  }
 0x327   : > { %s2842_s21 = sld [smem:[#allocation33_spill]]  ;;  %s1202_s23 = sshll.u32 %s573_s8, 4  ;;  %s2638_s23 = int_to_ptr.vmem [resolvable:$true] %s1202_s23 }
 0x328   : > { %s2843_s27 = sld [smem:[#allocation34_spill]]  ;;  %s1164_s17 = scalar_lea.sflag [#allocation4], %s2441_s13 }
 0x329   : > { %s1991_s25 = scalar_lea.vmem %s2638_s23, 128  ;;  %s2172_s14 = smov [#allocation10]  }
 0x32a   : > { %p1992_p1 = scmp.ne.s32.totalorder %s2638_s23, %s1991_s25  ;;  %s1995_s11 = sshll.u32 %s2172_s14, 4  ;;  %s1996_s11 = int_to_ptr.vmem [resolvable:$false] %s1995_s11 }
 0x32b   : > { %s1997_s8 = scalar_lea.vmem %s1996_s11, 256  ;;  %p1998_p7 = scmp.lt.s32.totalorder %s2638_s23, %s1996_s11 }
 0x32c   : > { %p1993_p10 = pnand %p1992_p1, %p2840_p6  ;;  %p1999_p9 = scmp.lt.s32.totalorder %s1997_s8, %s1991_s25 }
 0x32d   : > { %s2634_s28 = scalar_lea.hbm %s2842_s21, %s2574_s15 }
 0x32e   : > { %s2844_s30 = smov %s2843_s27  ;;  %s2644_s1 = scalar_lea.hbm %s2843_s27, %s2574_s15 }
 0x32f   : > { %p1994_p4 = pneg %p1993_p10  ;;  %p2000_p5 = por %p1999_p9, %p1998_p7 }
 0x331   : > { %p2001_p2 = pnand %p2000_p5, %p1994_p4 }
 0x333   : > { %2004 = shalt.err (!%p2001_p2)
}
 0x334   : > { %s2005_s18 = scalar_lea.hbm %s2634_s28, 128  ;;  %s2009_s10 = scalar_lea.hbm %s2842_s21, 256 }
 0x335   : > { %p2006_p3 = scmp.ne.s32.totalorder %s2634_s28, %s2005_s18  ;;  %p2010_p8 = scmp.lt.u32.totalorder %s2634_s28, %s2842_s21 }
 0x336   : > { %p2011_p13 = scmp.lt.u32.totalorder %s2009_s10, %s2005_s18  ;;  %p2013_p1 = scmp.lt.u32.totalorder %s2005_s18, %s2634_s28 }
 0x337   : > { %p2007_p12 = pnand %p2006_p3, %p2840_p6 }
 0x338   : > { %p2012_p11 = por %p2011_p13, %p2010_p8 }
 0x339   : > { %p2008_p0 = pneg %p2007_p12 }
 0x33a   : > { %p2014_p10 = por %p2013_p1, %p2012_p11 }
 0x33c   : > { %p2015_p4 = pnand %p2014_p10, %p2008_p0 }
 0x33e   : > { %2018 = shalt.err (!%p2015_p4)
}
 0x33f   : > { %1710 = dma.vmem_to_hbm [thread:$0]  (%p2840_p6), %s2638_s23, 128, %s2634_s28, %s1164_s17  }
 0x340   : > { %s2845_s25 = scalar_lea.vmem [#allocation13], %s2444_s12  ;;  %s2173_s22 = smov [#allocation13]  }
 0x341   : > { %s1228_s11 = sshll.u32 %s2845_s25, 4  ;;  %s2023_s18 = sshll.u32 %s2173_s22, 4  ;;  %s1229_s11 = int_to_ptr.vmem [resolvable:$true] %s1228_s11  ;;  %s2024_s18 = int_to_ptr.vmem [resolvable:$false] %s2023_s18 }
 0x342   : > { %s2019_s8 = scalar_lea.vmem %s1229_s11, 128  ;;  %s2025_s16 = scalar_lea.vmem %s2024_s18, 256 }
 0x343   : > { %p2020_p7 = scmp.ne.s32.totalorder %s1229_s11, %s2019_s8  ;;  %p2026_p2 = scmp.lt.s32.totalorder %s1229_s11, %s2024_s18 }
 0x344   : > { %p2027_p3 = scmp.lt.s32.totalorder %s2025_s16, %s2019_s8 }
 0x345   : > { %p2021_p9 = pnand %p2020_p7, %p2840_p6 }
 0x346   : > { %p2028_p12 = por %p2027_p3, %p2026_p2 }
 0x347   : > { %p2022_p5 = pneg %p2021_p9 }
 0x349   : > { %p2029_p0 = pnand %p2028_p12, %p2022_p5 }
 0x34b   : > { %2032 = shalt.err (!%p2029_p0)
}
 0x34c   : > { %s2033_s17 = scalar_lea.hbm %s2644_s1, 128  ;;  %s2037_s10 = scalar_lea.hbm %s2844_s30, 256 }
 0x34d   : > { %p2034_p8 = scmp.ne.s32.totalorder %s2644_s1, %s2033_s17  ;;  %p2038_p1 = scmp.lt.u32.totalorder %s2644_s1, %s2844_s30 }
 0x34e   : > { %p2039_p10 = scmp.lt.u32.totalorder %s2037_s10, %s2033_s17  ;;  %p2041_p7 = scmp.lt.u32.totalorder %s2033_s17, %s2644_s1 }
 0x34f   : > { %p2035_p13 = pnand %p2034_p8, %p2840_p6 }
 0x350   : > { %p2040_p4 = por %p2039_p10, %p2038_p1 }
 0x351   : > { %p2036_p11 = pneg %p2035_p13 }
 0x352   : > { %p2042_p9 = por %p2041_p7, %p2040_p4 }
 0x354   : > { %p2043_p5 = pnand %p2042_p9, %p2036_p11 }
 0x356   : > { %2046 = shalt.err (!%p2043_p5)
}
 0x357   : > { %s2846_s25 = scalar_lea.sflag [#allocation12], %s2453_s24  ;;  %s601_s8 = scalar_lea.vmem [#allocation16], %s2444_s12 }
 0x358   : > { %1712 = dma.vmem_to_hbm [thread:$0]  (%p2840_p6), %s1229_s11, 128, %s2644_s1, %s2846_s25  }
 0x359   : > { %s1254_s22 = sshll.u32 %s601_s8, 4  ;;  %s2813_s18 = scalar_lea.vmem [#allocation17], %s2444_s12  ;;  %s2700_s22 = int_to_ptr.vmem [resolvable:$true] %s1254_s22 }
 0x35a   : > { %s1267_s16 = sshll.u32 %s2813_s18, 4  ;;  %s2847_s23 = sld [smem:[#allocation36_spill]]  ;;  %s2709_s16 = int_to_ptr.vmem [resolvable:$true] %s1267_s16 }
 0x35b   : > { %s2848_s27 = sld [smem:[#allocation37_spill]]  ;;  %s2047_s17 = scalar_lea.vmem %s2700_s22, 128 }
 0x35c   : > { %p2048_p2 = scmp.ne.s32.totalorder %s2700_s22, %s2047_s17  ;;  %s2174_s28 = smov [#allocation16]  }
 0x35d   : > { %s2051_s18 = sshll.u32 %s2174_s28, 4  ;;  %s2052_s18 = int_to_ptr.vmem [resolvable:$false] %s2051_s18 }
 0x35e   : > { %p2049_p3 = pnand %p2048_p2, %p2840_p6  ;;  %s2053_s29 = scalar_lea.vmem %s2052_s18, 256 }
 0x35f   : > { %p2054_p0 = scmp.lt.s32.totalorder %s2700_s22, %s2052_s18  ;;  %p2055_p8 = scmp.lt.s32.totalorder %s2053_s29, %s2047_s17 }
 0x360   : > { %s2697_s10 = scalar_lea.hbm %s2847_s23, %s2574_s15  ;;  %p2050_p12 = pneg %p2049_p3 }
 0x361   : > { %s2849_s14 = smov %s2848_s27  ;;  %s2707_s25 = scalar_lea.hbm %s2848_s27, %s2574_s15 }
 0x362   : > { %p2056_p13 = por %p2055_p8, %p2054_p0 }
 0x364   : > { %p2057_p11 = pnand %p2056_p13, %p2050_p12 }
 0x386   : > { %v996_v32 = vpop.xlane.xlu0 %995 }
 0x387   : > { %v1158_v33 = vpop.xlane.xlu1 %1157  ;;  %1811 = vlog2.f32 %v996_v32 }
 0x388   : > { %1813 = vlog2.f32 %v1158_v33 }
 0x391   : > { %v1812_v34 = vpop.eup %1811 }
 0x392   : > { %v1814_v35 = vpop.eup %1813  ;;  %v998_v36 = vmul.f32 0.6931472, %v1812_v34 }
 0x393   : > { %v1160_v37 = vmul.f32 0.6931472, %v1814_v35 }
 0x394   : > { %v999_v38 = vsub.f32 %v2547_v8, %v998_v36 }
 0x395   : > { %v1161_v39 = vsub.f32 %v2549_v9, %v1160_v37 }
 0x396   : > { %1000 = vst.msk [vmem:[%s601_s8] sm:$0xff] %vm612_vm1, %v999_v38 }
 0x397   : > { %2060 = shalt.err (!%p2057_p11)
}
 0x398   : > { %s2061_s15 = scalar_lea.hbm %s2697_s10, 128  ;;  %s2065_s11 = scalar_lea.hbm %s2847_s23, 256 }
 0x399   : > { %p2062_p1 = scmp.ne.s32.totalorder %s2697_s10, %s2061_s15  ;;  %p2066_p7 = scmp.lt.u32.totalorder %s2697_s10, %s2847_s23 }
 0x39a   : > { %p2067_p9 = scmp.lt.u32.totalorder %s2065_s11, %s2061_s15  ;;  %p2069_p2 = scmp.lt.u32.totalorder %s2061_s15, %s2697_s10 }
 0x39b   : > { %p2063_p10 = pnand %p2062_p1, %p2840_p6 }
 0x39c   : > { %p2068_p5 = por %p2067_p9, %p2066_p7 }
 0x39d   : > { %p2064_p4 = pneg %p2063_p10 }
 0x39e   : > { %p2070_p3 = por %p2069_p2, %p2068_p5 }
 0x3a0   : > { %p2071_p12 = pnand %p2070_p3, %p2064_p4 }
 0x3a2   : > { %2074 = shalt.err (!%p2071_p12)
}
 0x3a3   : > { %s2850_s29 = scalar_lea.sflag [#allocation15], %s2453_s24  ;;  %s2851_s17 = scalar_lea.vmem [#allocation17], %s2444_s12 }
 0x3a4   : > { %1714 = dma.vmem_to_hbm [thread:$0]  (%p2840_p6), %s2700_s22, 128, %s2697_s10, %s2850_s29   ;;  %1162 = vst.msk [vmem:[%s2851_s17] sm:$0xff] %vm612_vm1, %v1161_v39 }
 0x3a5   : > { %s1189_s28 = scalar_lea.sflag [#allocation18], %s2441_s13  ;;  %s2075_s15 = scalar_lea.vmem %s2709_s16, 128 }
 0x3a6   : > { %p2076_p0 = scmp.ne.s32.totalorder %s2709_s16, %s2075_s15  ;;  %s2175_s8 = smov [#allocation17]  }
 0x3a7   : > { %s2079_s24 = sshll.u32 %s2175_s8, 4  ;;  %s2080_s24 = int_to_ptr.vmem [resolvable:$false] %s2079_s24 }
 0x3a8   : > { %p2077_p8 = pnand %p2076_p0, %p2840_p6  ;;  %s2081_s1 = scalar_lea.vmem %s2080_s24, 256 }
 0x3a9   : > { %p2082_p11 = scmp.lt.s32.totalorder %s2709_s16, %s2080_s24  ;;  %p2083_p1 = scmp.lt.s32.totalorder %s2081_s1, %s2075_s15 }
 0x3aa   : > { %p2078_p13 = pneg %p2077_p8 }
 0x3ab   : > { %p2084_p10 = por %p2083_p1, %p2082_p11 }
 0x3ad   : > { %p2085_p4 = pnand %p2084_p10, %p2078_p13 }
 0x3af   : > { %2088 = shalt.err (!%p2085_p4)
}
 0x3b0   : > { %s2089_s13 = scalar_lea.hbm %s2707_s25, 128  ;;  %s2093_s10 = scalar_lea.hbm %s2849_s14, 256 }
 0x3b1   : > { %p2090_p7 = scmp.ne.s32.totalorder %s2707_s25, %s2089_s13  ;;  %p2094_p2 = scmp.lt.u32.totalorder %s2707_s25, %s2849_s14 }
 0x3b2   : > { %p2095_p3 = scmp.lt.u32.totalorder %s2093_s10, %s2089_s13  ;;  %p2097_p0 = scmp.lt.u32.totalorder %s2089_s13, %s2707_s25 }
 0x3b3   : > { %p2091_p9 = pnand %p2090_p7, %p2840_p6 }
 0x3b4   : > { %p2096_p12 = por %p2095_p3, %p2094_p2 }
 0x3b5   : > { %p2092_p5 = pneg %p2091_p9 }
 0x3b6   : > { %p2098_p8 = por %p2097_p0, %p2096_p12 }
 0x3b8   : > { %p2099_p13 = pnand %p2098_p8, %p2092_p5 }
 0x3ba   : > { %2102 = shalt.err (!%p2099_p13)
}
 0x3bb   : > { %1715 = dma.vmem_to_hbm [thread:$0]  (%p2840_p6), %s2709_s16, 128, %s2707_s25, %s1189_s28  }
 0x3bc PF: > { %s2852_s18 = sld [smem:[#allocation26_spill]]  ;;  %s2853_s29 = sld [smem:[#allocation31_spill]] }
 0x3bd   : > { %s2854_s17 = sld [smem:[#allocation28_spill]] }
 0x3c2   : > { %s1279_s15 = sand.u32 1, %s2852_s18   ;;  %p2855_p11 = scmp.ne.s32.totalorder %s2853_s29, 0 }
 0x3c3   : > { %p2856_p1 = scmp.ge.s32.totalorder %s2854_s17, 2  ;;  %s1280_s8 = scalar_lea.sflag [#allocation4], %s1279_s15 }
 0x3c5   : > { %p1736_p10 = pnand %p2856_p1, %p2855_p11 }
 0x3c7   : > { %2132 = dma.done.wait (!%p1736_p10), %s1280_s8, 128  }
 0x3c8   : > { %2134 = vsyncadd (!%p1736_p10), %s1280_s8, 4294967168  ;;  %s2857_s24 = sadd.s32 4294967294, %s2854_s17  }
 0x3c9   : > { %s1288_s1 = sand.u32 1, %s2857_s24  }
 0x3ca   : > { %s1289_s13 = scalar_lea.sflag [#allocation12], %s1288_s1 }
 0x3cb   : > { %2136 = dma.done.wait (!%p1736_p10), %s1289_s13, 256  }
 0x3cc   : > { %2138 = vsyncadd (!%p1736_p10), %s1289_s13, 4294967040  ;;  %s1307_s19 = scalar_lea.sflag [#allocation15], %s1288_s1 }
 0x3cd   : > { %2140 = dma.done.wait (!%p1736_p10), %s1307_s19, 256  }
 0x3ce   : > { %2142 = vsyncadd (!%p1736_p10), %s1307_s19, 4294967040  ;;  %s1325_s16 = scalar_lea.sflag [#allocation18], %s1279_s15 }
 0x3cf   : > { %2144 = dma.done.wait (!%p1736_p10), %s1325_s16, 128  }
 0x3d0   : > { %2146 = vsyncadd (!%p1736_p10), %s1325_s16, 4294967168  ;;  %s2858_s28 = sld [smem:[#allocation29_spill]]  ;;  %s2859_s12 = sld [smem:[#allocation27_spill]] }
 0x3d1   : > { %s2860_s27 = sld [smem:[#allocation30_spill]]  ;;  %s2861_s25 = smov %s2153_s26 }
 0x3d6   : > { %p42_p6 = scmp.ge.s32.totalorder %s2858_s28, 4   ;;  %s2862_s26 = smov %s2859_s12 }
 0x3d8   :  { %44 = sbr.rel (!%p42_p6) target bundleno = 22 (0x16), region = 217 }
 0x3df   :  { %1330 = vsyncpa [#allocation3], 1 }
 0x3e0   :  { %1332 = vsyncpa [#allocation3 + $0x1], 1 }
 0x3e1   :  { %1333 = vsyncpa [#allocation6], 1 }
 0x3e2   :  { %1335 = vsyncpa [#allocation6 + $0x1], 1 }
 0x3e3   :  { %1336 = vsyncpa [#allocation9], 1 }
 0x3e4   :  { %1338 = vsyncpa [#allocation9 + $0x1], 1 }
 0x3e5   :  { %1339 = vsyncpa [#allocation4], 1 }
 0x3e6   :  { %1341 = vsyncpa [#allocation4 + $0x1], 1 }
 0x3e7   :  { %1342 = vsyncpa [#allocation12], 1 }
 0x3e8   :  { %1344 = vsyncpa [#allocation12 + $0x1], 1 }
 0x3e9   :  { %1345 = vsyncpa [#allocation15], 1 }
 0x3ea   :  { %1347 = vsyncpa [#allocation15 + $0x1], 1 }
 0x3eb   :  { %1348 = vsyncpa [#allocation18], 1 }
 0x3ec   :  { %1350 = vsyncpa [#allocation18 + $0x1], 1 }

</bundles_post_ra>
